<compile_context>
chip_gen: v6e
topology: v6e:2x2x1
jax: 0.10.0
libtpu: 0.0.40
codegen_flags: <defaults>
</compile_context>

<pallas_src>
import functools

import jax
import jax.numpy as jnp
from jax import lax
from jax.experimental import pallas as pl
from jax.experimental.pallas import tpu as pltpu


def _gemm_bias_lrelu_kernel(x_ref, w_ref, b_ref, o_ref, *, slope):
    """One (col-stripe, row-block) tile.

    x_ref : (TH, KH*W*Cin)    im2row input rows (lane order: kh, w, ci)
    w_ref : (KH*W*Cin, CT)    block-Toeplitz weights (column stripe)
    b_ref : (1, CT)           bias tiled across output columns (f32)
    o_ref : (TH, CT)          output rows (lane order: x, co)
    """
    acc = jnp.dot(x_ref[...], w_ref[...], preferred_element_type=jnp.float32)
    acc = acc + b_ref[...]
    acc = jnp.maximum(acc, slope * acc)          # LeakyReLU(0.2): 2 VALU ops
    o_ref[...] = acc.astype(o_ref.dtype)


def build_conv_gemm_weights(w_oihw, bias, *, width, padding, compute_dtype):
    """Banded block-Toeplitz weights (KH*W*Cin, Wo*Cout) + bias row (1, Wo*Cout).

    Depends only on the weights and static shapes -> hoist/cache when chaining.
    Width zero-padding is folded in (out-of-range taps stay zero).
    """
    Cout, Cin, KH, KW = w_oihw.shape
    Wo = width + 2 * padding - KW + 1
    w_hwio = jnp.transpose(w_oihw, (2, 3, 1, 0)).astype(compute_dtype)  # (KH,KW,Cin,Cout)

    # Banded construction (adjacent advanced indices -> in-place result dims).
    w_cols = jnp.zeros((KH, Cin, Cout, width, Wo), compute_dtype)
    for kw in range(KW):
        shift = kw - padding                      # input col xw = out col x + shift
        x_lo = max(0, -shift)
        x_hi = min(Wo, width - shift)
        if x_hi <= x_lo:
            continue
        xs = jnp.arange(x_lo, x_hi)
        xws = xs + shift
        upd = jnp.broadcast_to(w_hwio[:, kw][..., None],
                               (KH, Cin, Cout, x_hi - x_lo))
        w_cols = w_cols.at[:, :, :, xws, xs].set(upd)

    # (KH, Cin, Cout, W, Wo) -> (KH, W, Cin, Wo, Cout) -> (KH*W*Cin, Wo*Cout)
    w_gemm = jnp.transpose(w_cols, (0, 3, 1, 4, 2)).reshape(KH * width * Cin,
                                                            Wo * Cout)
    b_row = jnp.tile(bias.astype(jnp.float32), (Wo,)).reshape(1, Wo * Cout)
    return w_gemm, b_row


def _pick_row_tile(rows, bytes_per_row, budget_bytes):
    for t in (512, 256, 128, 64, 32, 16, 8):
        if t <= rows and rows % t == 0 and 2 * t * bytes_per_row <= budget_bytes:
            return t
    return 8


def _pick_col_tile(wocout, max_cols=2048):
    if wocout <= max_cols or wocout % 128 != 0:
        return wocout
    for ct in (2048, 1024, 512, 256, 128):
        if ct <= max_cols and wocout % ct == 0:
            return ct
    return wocout


def conv2d_layer_forward(x_nchw, w_oihw, bias, *, padding=1, lrelu_slope=0.2,
                         compute_dtype=None, out_dtype=None,
                         row_tile=None, col_tile=None):
    """Pallas implementation of Conv2dLayer.forward (zero pad, stride=1,
    dilation=1, no norm, LeakyReLU(0.2)).  Input/output are NCHW."""
    N, Cin, H, W = x_nchw.shape
    Cout, Cin_w, KH, KW = w_oihw.shape
    assert Cin_w == Cin
    if compute_dtype is None:
        compute_dtype = x_nchw.dtype
    if out_dtype is None:
        out_dtype = x_nchw.dtype

    Ho = H + 2 * padding - KH + 1
    Wo = W + 2 * padding - KW + 1
    assert Ho > 0 and Wo > 0

    Ho_pad = -(-Ho // 8) * 8            # sublane-aligned output rows per image
    WCin = W * Cin
    KWC = KH * WCin
    WoCout = Wo * Cout
    R_total = N * Ho_pad                # batch folded into the row axis

    # ---- tile selection (VMEM budget keeps us valid on v7x's 64 MiB) ----
    in_item = jnp.dtype(compute_dtype).itemsize
    out_item = jnp.dtype(out_dtype).itemsize

    CT = col_tile if col_tile is not None else _pick_col_tile(WoCout)
    if WoCout % CT != 0 or not (CT == WoCout or CT % 128 == 0):
        raise ValueError(f"col_tile={CT} must divide {WoCout} and be a multiple "
                         f"of 128 (or the full width)")

    bytes_per_row = KWC * in_item + CT * out_item
    TH = row_tile if row_tile is not None else _pick_row_tile(
        R_total, bytes_per_row, budget_bytes=12 << 20)
    if R_total % TH != 0 or TH % 8 != 0:
        raise ValueError(f"row_tile={TH} must be a multiple of 8 dividing {R_total}")

    blk_bytes = (2 * TH * KWC * in_item + 2 * TH * CT * out_item
                 + 2 * KWC * CT * in_item + 2 * CT * 4)
    vmem_limit = None
    if blk_bytes > (12 << 20):          # only raise the scoped limit when needed
        vmem_limit = int(min(blk_bytes + (8 << 20), 48 << 20))

    # ---- layout glue: NCHW -> (N, H, W*Cin), zero-pad H, im2row over rows ----
    x_rows = jnp.transpose(x_nchw, (0, 2, 3, 1)).reshape(N, H, WCin)
    x_rows = x_rows.astype(compute_dtype)
    rows_total = Ho_pad + KH - 1        # per-image rows (>= H + 2*padding)
    x_rows = jnp.pad(x_rows, ((0, 0), (padding, rows_total - H - padding), (0, 0)))
    # KH shifted row windows side-by-side on the lane axis -> rows are independent
    x_gemm = jnp.concatenate([x_rows[:, kh:kh + Ho_pad, :] for kh in range(KH)],
                             axis=-1).reshape(R_total, KWC)

    # ---- banded block-Toeplitz weights + bias row (cacheable) ----
    w_gemm, b_row = build_conv_gemm_weights(
        w_oihw, bias, width=W, padding=padding, compute_dtype=compute_dtype)

    grid = (WoCout // CT, R_total // TH)   # column stripes outer, row blocks inner
    kernel = functools.partial(_gemm_bias_lrelu_kernel, slope=lrelu_slope)

    out_rows = pl.pallas_call(
        kernel,
        out_shape=jax.ShapeDtypeStruct((R_total, WoCout), out_dtype),
        grid_spec=pltpu.PrefetchScalarGridSpec(
            num_scalar_prefetch=0,
            grid=grid,
            in_specs=[
                pl.BlockSpec((TH, KWC), lambda c, r: (r, 0)),   # im2row rows
                pl.BlockSpec((KWC, CT), lambda c, r: (0, c)),   # Toeplitz weights
                pl.BlockSpec((1, CT), lambda c, r: (0, c)),     # bias (f32)
            ],
            out_specs=pl.BlockSpec((TH, CT), lambda c, r: (r, c)),
        ),
        compiler_params=pltpu.CompilerParams(
            dimension_semantics=("parallel", "parallel"),
            vmem_limit_bytes=vmem_limit),
    )(x_gemm, w_gemm, b_row)

    out = out_rows.reshape(N, Ho_pad, Wo, Cout)[:, :Ho]
    return jnp.transpose(out, (0, 3, 1, 2))               # back to NCHW


def _reference(x_nchw, w_oihw, bias, *, padding=1, lrelu_slope=0.2):
    y = lax.conv_general_dilated(
        x_nchw, w_oihw, window_strides=(1, 1),
        padding=[(padding, padding), (padding, padding)],
        dimension_numbers=("NCHW", "OIHW", "NCHW"))
    y = y + bias[None, :, None, None]
    return jnp.where(y > 0, y, lrelu_slope * y)


if __name__ == "__main__":
    # Module config: Conv2dLayer(in_channels=4, out_channels=8, kernel_size=3,
    #                            stride=1, padding=1) -> zero pad + lrelu(0.2)
    N, Cin, H, W = 2, 4, 16, 16
    Cout, K = 8, 3
    padding = 1

    key = jax.random.PRNGKey(0)
    kx, kw, kb = jax.random.split(key, 3)
    x = jax.random.normal(kx, (N, Cin, H, W), dtype=jnp.float32)
    weight = jax.random.normal(kw, (Cout, Cin, K, K), dtype=jnp.float32) * 0.1
    bias = jax.random.normal(kb, (Cout,), dtype=jnp.float32) * 0.1

    ref = _reference(x, weight, bias, padding=padding)

    # f32 path, default (coarsest) tiling: grid (1, 1), one 32x192x128 matmul.
    out = conv2d_layer_forward(x, weight, bias, padding=padding)
    out = jax.block_until_ready(out)
    assert out.shape == (N, Cout, H, W)
    assert jnp.allclose(out, ref, atol=1e-4, rtol=1e-4), "f32 mismatch vs reference conv"

    # Multi-row-block grid path (row_tile=8 -> grid (1, 4)).
    out_t = conv2d_layer_forward(x, weight, bias, padding=padding, row_tile=8)
    out_t = jax.block_until_ready(out_t)
    assert jnp.allclose(out_t, ref, atol=1e-4, rtol=1e-4), "tiled-path mismatch"

    # bf16-operand / f32-accumulate path (halves operand HBM traffic on
    # v5e/v6e/v7x; epilogue stays f32). Tightened tolerance per review.
    out_bf16 = conv2d_layer_forward(x, weight, bias, padding=padding,
                                    compute_dtype=jnp.bfloat16)
    out_bf16 = jax.block_until_ready(out_bf16)
    assert jnp.allclose(out_bf16, ref, atol=3e-2, rtol=3e-2), "bf16 mismatch vs reference conv"

    print("KERNEL_OK")
</pallas_src>

<mosaic_0001>
module attributes {stable_mosaic.version = 11 : i64} {
  func.func @_gemm_bias_lrelu_kernel(%arg0: i32, %arg1: i32, %arg2: memref<32x192xf32, #tpu.memory_space<vmem>>, %arg3: memref<192x128xf32, #tpu.memory_space<vmem>>, %arg4: memref<1x128xf32, #tpu.memory_space<vmem>>, %arg5: memref<32x128xf32, #tpu.memory_space<vmem>>) attributes {dimension_semantics = [#tpu.dimension_semantics<parallel>, #tpu.dimension_semantics<parallel>], iteration_bounds = array<i64: 1, 1>, scalar_prefetch = 0 : i64, scratch_operands = 0 : i64, tpu.core_type = #tpu.core_type<tc>, window_params = [{transform_indices = @transform_0, window_bounds = array<i64: 32, 192>}, {transform_indices = @transform_1, window_bounds = array<i64: 192, 128>}, {transform_indices = @transform_2, window_bounds = array<i64: 1, 128>}, {transform_indices = @transform_3, window_bounds = array<i64: 32, 128>}]} {
    %c0 = arith.constant 0 : index
    %c0_0 = arith.constant 0 : index
    %0 = vector.load %arg2[%c0, %c0_0] : memref<32x192xf32, #tpu.memory_space<vmem>>, vector<32x192xf32>
    %c0_1 = arith.constant 0 : index
    %c0_2 = arith.constant 0 : index
    %1 = vector.load %arg3[%c0_1, %c0_2] : memref<192x128xf32, #tpu.memory_space<vmem>>, vector<192x128xf32>
    %cst = arith.constant dense<0.000000e+00> : vector<32x128xf32>
    %2 = tpu.matmul %0, %1, %cst {dimension_numbers = #tpu.dot_dimension_numbers<[1], [0], [0], [1], [0, 0, 1, 1], [], []>} : vector<32x192xf32>, vector<192x128xf32>, vector<32x128xf32> -> vector<32x128xf32>
    %c0_3 = arith.constant 0 : index
    %c0_4 = arith.constant 0 : index
    %3 = vector.load %arg4[%c0_3, %c0_4] : memref<1x128xf32, #tpu.memory_space<vmem>>, vector<1x128xf32>
    %4 = vector.broadcast %3 : vector<1x128xf32> to vector<32x128xf32>
    %5 = arith.addf %2, %4 : vector<32x128xf32>
    %cst_5 = arith.constant 2.000000e-01 : f32
    %6 = vector.broadcast %cst_5 : f32 to vector<32x128xf32>
    %7 = arith.mulf %6, %5 : vector<32x128xf32>
    %8 = arith.maximumf %5, %7 : vector<32x128xf32>
    %c0_6 = arith.constant 0 : index
    %c0_7 = arith.constant 0 : index
    %9 = vector.load %arg5[%c0_6, %c0_7] : memref<32x128xf32, #tpu.memory_space<vmem>>, vector<32x128xf32>
    tpu.vector_store %arg5[%c0_6, %c0_7], %8 {strides = array<i32>} : memref<32x128xf32, #tpu.memory_space<vmem>>, vector<32x128xf32>,
    return
  }
  func.func @transform_0(%arg0: i32, %arg1: i32) -> (i32, i32) {
    %c0_i32 = arith.constant 0 : i32
    %c0_i32_0 = arith.constant 0 : i32
    return %arg1, %c0_i32 : i32, i32
  }
  func.func @transform_1(%arg0: i32, %arg1: i32) -> (i32, i32) {
    %c0_i32 = arith.constant 0 : i32
    %c0_i32_0 = arith.constant 0 : i32
    return %c0_i32, %arg0 : i32, i32
  }
  func.func @transform_2(%arg0: i32, %arg1: i32) -> (i32, i32) {
    %c0_i32 = arith.constant 0 : i32
    %c0_i32_0 = arith.constant 0 : i32
    return %c0_i32, %arg0 : i32, i32
  }
  func.func @transform_3(%arg0: i32, %arg1: i32) -> (i32, i32) {
    %c0_i32 = arith.constant 0 : i32
    return %arg1, %arg0 : i32, i32
  }
}

</mosaic_0001>

<bundles_post_ra>
// kernel: tpu_custom_call.1
= control target key start
LH: loop header
LB: loop body
LE: loop exit
PB: predicated region body
PF: predicated region fallthrough
CT: control target
= control target key end

     0   :  { %8 = vsyncpa [#allocation3], 0  ;;  %s431_s0 = inlined_call_operand.hbm [shape: f32[32,192], index: 0, kind: input, shape index: {}]   ;;  %s432_s1 = inlined_call_operand.hbm [shape: f32[192,128], index: 1, kind: input, shape index: {}]   ;;  %s433_s2 = inlined_call_operand.vmem [shape: f32[1,128], index: 2, kind: input, shape index: {}]   ;;  %s434_s3 = inlined_call_operand.hbm [shape: f32[32,128], index: 3, kind: output, shape index: {}]  }
   0x1   :  { %9 = vsyncpa [#allocation6], 0 }
   0x2   :  { %10 = vsyncpa [#allocation4], 0  ;;  %s337_s12 = smov [#allocation2]  }
   0x3   :  { %s16_s13 = sshll.u32 %s337_s12, 4  ;;  %s17_s13 = int_to_ptr.vmem [resolvable:$true] %s16_s13 }
   0x4   :  { %s279_s14 = scalar_lea.vmem %s17_s13, 1024  ;;  %p284_p1 = scmp.lt.s32.totalorder %s17_s13, %s17_s13 }
   0x5   :  { %p280_p0 = scmp.ne.s32.totalorder %s17_s13, %s279_s14  ;;  %p285_p2 = scmp.lt.s32.totalorder %s279_s14, %s279_s14 }
   0x7   :  { %p286_p3 = por %p285_p2, %p284_p1 }
   0x9   :  { %p287_p4 = pnand %p286_p3, %p280_p0 }
   0xb   :  { %290 = shalt.err (!%p287_p4)
}
   0xc   :  { %s338_s15 = smov 256   ;;  %s339_s16 = smov 16  }
   0xd   :  { %22 = dma.hbm_to_vmem [thread:$0]  %s431_s0, 1024, %s17_s13, [#allocation3], %s338_s15, %s338_s15, %s339_s16  }
   0xe   :  { %s340_s19 = smov [#allocation5]  }
   0xf   :  { %s28_s20 = sshll.u32 %s340_s19, 4  ;;  %s29_s20 = int_to_ptr.vmem [resolvable:$true] %s28_s20 }
  0x10   :  { %s299_s21 = scalar_lea.vmem %s29_s20, 3072  ;;  %p304_p6 = scmp.lt.s32.totalorder %s29_s20, %s29_s20 }
  0x11   :  { %p300_p5 = scmp.ne.s32.totalorder %s29_s20, %s299_s21  ;;  %p305_p7 = scmp.lt.s32.totalorder %s299_s21, %s299_s21 }
  0x13   :  { %p306_p8 = por %p305_p7, %p304_p6 }
  0x15   :  { %p307_p9 = pnand %p306_p8, %p300_p5 }
  0x17   :  { %310 = shalt.err (!%p307_p9)
}
  0x18   :  { %s341_s22 = smov 128   ;;  %s342_s23 = smov 8  }
  0x19   :  { %34 = dma.hbm_to_vmem [thread:$0]  %s432_s1, 3072, %s29_s20, [#allocation6], %s341_s22, %s341_s22, %s342_s23  }
  0x1a   :  { %331 = dma.done.wait [#allocation3], 1024  }
  0x1b   :  { %332 = vsyncadd [#allocation3], 4294966272 }
  0x1c   :  { %333 = dma.done.wait [#allocation6], 3072  }
  0x1d   :  { %334 = vsyncadd [#allocation6], 4294964224  ;;  %v343_v0 = vmov 0.0   ;;  %v66_v1 = vld [vmem:[#allocation5 + $0x78] sm:$0xff]  ;;  %v65_v2 = vld [vmem:[#allocation5 + $0x70] sm:$0xff]  ;;  %vm82_vm0 = vcmask 523264  }
  0x1e   :  { %95 = vmatprep.subr.mxu0 %v343_v0  ;;  %215 = vmatprep.subr.mxu1 %v343_v0  ;;  %v64_v3 = vld [vmem:[#allocation5 + $0x68] sm:$0xff]  ;;  %v63_v4 = vld [vmem:[#allocation5 + $0x60] sm:$0xff]  ;;  %v62_v5 = vld [vmem:[#allocation5 + $0x58] sm:$0xff]  ;;  %s344_s26 = smov [#allocation7]  }
  0x1f   :  { %96 = vmatpush1.msra.mxu0 %v66_v1  ;;  %239 = vmatpush1.msra.mxu1 %v66_v1  ;;  %v61_v6 = vld [vmem:[#allocation5 + $0x50] sm:$0xff]  ;;  %v60_v7 = vld [vmem:[#allocation5 + $0x48] sm:$0xff]  ;;  %v59_v8 = vld [vmem:[#allocation5 + $0x40] sm:$0xff]  ;;  %s197_s27 = sshll.u32 %s344_s26, 4  ;;  %s198_s27 = int_to_ptr.vmem [resolvable:$true] %s197_s27 }
  0x20   :  { %97 = vmatprep.subr.mxu0 %v343_v0  ;;  %216 = vmatprep.subr.mxu1 %v343_v0  ;;  %v58_v9 = vld [vmem:[#allocation5 + $0x38] sm:$0xff]  ;;  %v57_v10 = vld [vmem:[#allocation5 + $0x30] sm:$0xff]  ;;  %v56_v11 = vld [vmem:[#allocation5 + $0x28] sm:$0xff]  ;;  %p316_p11 = scmp.lt.s32.totalorder %s198_s27, %s198_s27 }
  0x21   :  { %98 = vmatpush1.msra.mxu0 %v65_v2  ;;  %240 = vmatpush1.msra.mxu1 %v65_v2  ;;  %v55_v12 = vld [vmem:[#allocation5 + $0x20] sm:$0xff]  ;;  %v54_v13 = vld [vmem:[#allocation5 + $0x18] sm:$0xff]  ;;  %v53_v14 = vld [vmem:[#allocation5 + $0x10] sm:$0xff] }
  0x22   :  { %99 = vmatprep.subr.mxu0 %v343_v0  ;;  %217 = vmatprep.subr.mxu1 %v343_v0  ;;  %v52_v15 = vld [vmem:[#allocation5 + $0x8] sm:$0xff]  ;;  %v51_v16 = vld [vmem:[#allocation5] sm:$0xff]  ;;  %v74_v17 = vld [vmem:[#allocation5 + $0xb8] sm:$0xff] }
  0x23   :  { %100 = vmatpush1.msra.mxu0 %v64_v3  ;;  %241 = vmatpush1.msra.mxu1 %v64_v3  ;;  %v73_v18 = vld [vmem:[#allocation5 + $0xb0] sm:$0xff]  ;;  %v72_v19 = vld [vmem:[#allocation5 + $0xa8] sm:$0xff]  ;;  %v71_v20 = vld [vmem:[#allocation5 + $0xa0] sm:$0xff] }
  0x24   :  { %101 = vmatprep.subr.mxu0 %v343_v0  ;;  %218 = vmatprep.subr.mxu1 %v343_v0  ;;  %v70_v21 = vld [vmem:[#allocation5 + $0x98] sm:$0xff]  ;;  %v69_v22 = vld [vmem:[#allocation5 + $0x90] sm:$0xff]  ;;  %v68_v23 = vld [vmem:[#allocation5 + $0x88] sm:$0xff] }
  0x25   :  { %102 = vmatpush1.msra.mxu0 %v63_v4  ;;  %242 = vmatpush1.msra.mxu1 %v63_v4  ;;  %v67_v24 = vld [vmem:[#allocation5 + $0x80] sm:$0xff]  ;;  %v44_v25 = vld [vmem:[#allocation2 + $0x8] sm:$0xff]  ;;  %v46_v29 = vld [vmem:[#allocation2 + $0x18] sm:$0xff] }
  0x26   :  { %103 = vmatprep.subr.mxu0 %v343_v0  ;;  %219 = vmatprep.subr.mxu1 %v343_v0  ;;  %v48_v26 = vld [vmem:[#allocation2 + $0x28] sm:$0xff]  ;;  %v43_v27 = vld [vmem:[#allocation2] sm:$0xff]  ;;  %v50_v30 = vld [vmem:[#allocation2 + $0x38] sm:$0xff] }
  0x27   :  { %104 = vmatpush1.msra.mxu0 %v62_v5  ;;  %243 = vmatpush1.msra.mxu1 %v62_v5  ;;  %v47_v28 = vld [vmem:[#allocation2 + $0x20] sm:$0xff]  ;;  %v45_v31 = vld [vmem:[#allocation2 + $0x10] sm:$0xff] }
  0x28   :  { %105 = vmatprep.subr.mxu0 %v343_v0  ;;  %220 = vmatprep.subr.mxu1 %v343_v0  ;;  %v49_v32 = vld [vmem:[#allocation2 + $0x30] sm:$0xff]  ;;  %v210_v33 = vld [vmem:[%s433_s2] ss:$0 sm:$0xff]  ;;  %s311_s2 = scalar_lea.vmem %s198_s27, 512 }
  0x29   :  { %106 = vmatpush1.msra.mxu0 %v61_v6  ;;  %244 = vmatpush1.msra.mxu1 %v61_v6  ;;  %p312_p10 = scmp.ne.s32.totalorder %s198_s27, %s311_s2  ;;  %p317_p12 = scmp.lt.s32.totalorder %s311_s2, %s311_s2 }
  0x2a   :  { %107 = vmatprep.subr.mxu0 %v343_v0  ;;  %221 = vmatprep.subr.mxu1 %v343_v0 }
  0x2b   :  { %108 = vmatpush1.msra.mxu0 %v60_v7  ;;  %245 = vmatpush1.msra.mxu1 %v60_v7  ;;  %p318_p13 = por %p317_p12, %p316_p11 }
  0x2c   :  { %109 = vmatprep.subr.mxu0 %v343_v0  ;;  %222 = vmatprep.subr.mxu1 %v343_v0 }
  0x2d   :  { %110 = vmatpush1.msra.mxu0 %v59_v8  ;;  %246 = vmatpush1.msra.mxu1 %v59_v8  ;;  %p319_p0 = pnand %p318_p13, %p312_p10 }
  0x2e   :  { %111 = vmatprep.subr.mxu0 %v343_v0  ;;  %223 = vmatprep.subr.mxu1 %v343_v0 }
  0x2f   :  { %112 = vmatpush1.msra.mxu0 %v58_v9  ;;  %247 = vmatpush1.msra.mxu1 %v58_v9 }
  0x30   :  { %113 = vmatprep.subr.mxu0 %v343_v0  ;;  %224 = vmatprep.subr.mxu1 %v343_v0 }
  0x31   :  { %114 = vmatpush1.msra.mxu0 %v57_v10  ;;  %248 = vmatpush1.msra.mxu1 %v57_v10 }
  0x32   :  { %115 = vmatprep.subr.mxu0 %v343_v0  ;;  %225 = vmatprep.subr.mxu1 %v343_v0 }
  0x33   :  { %116 = vmatpush1.msra.mxu0 %v56_v11  ;;  %249 = vmatpush1.msra.mxu1 %v56_v11 }
  0x34   :  { %117 = vmatprep.subr.mxu0 %v343_v0  ;;  %226 = vmatprep.subr.mxu1 %v343_v0 }
  0x35   :  { %118 = vmatpush1.msra.mxu0 %v55_v12  ;;  %250 = vmatpush1.msra.mxu1 %v55_v12 }
  0x36   :  { %119 = vmatprep.subr.mxu0 %v343_v0  ;;  %227 = vmatprep.subr.mxu1 %v343_v0 }
  0x37   :  { %120 = vmatpush1.msra.mxu0 %v54_v13  ;;  %251 = vmatpush1.msra.mxu1 %v54_v13 }
  0x38   :  { %121 = vmatprep.subr.mxu0 %v343_v0  ;;  %228 = vmatprep.subr.mxu1 %v343_v0 }
  0x39   :  { %122 = vmatpush1.msra.mxu0 %v53_v14  ;;  %252 = vmatpush1.msra.mxu1 %v53_v14 }
  0x3a   :  { %123 = vmatprep.subr.mxu0 %v343_v0  ;;  %229 = vmatprep.subr.mxu1 %v343_v0 }
  0x3b   :  { %124 = vmatpush1.msra.mxu0 %v52_v15  ;;  %253 = vmatpush1.msra.mxu1 %v52_v15 }
  0x3c   :  { %125 = vmatprep.subr.mxu0 %v343_v0  ;;  %230 = vmatprep.subr.mxu1 %v343_v0 }
  0x3d   :  { %126 = vmatpush1.msra.mxu0 %v51_v16  ;;  %254 = vmatpush1.msra.mxu1 %v51_v16 }
  0x3e   :  { %143 = vmatprep.subr.mxu0 %v343_v0  ;;  %231 = vmatprep.subr.mxu1 %v343_v0 }
  0x3f   :  { %144 = vmatpush2.msra.mxu0 %v74_v17  ;;  %255 = vmatpush2.msra.mxu1 %v74_v17 }
  0x40   :  { %145 = vmatprep.subr.mxu0 %v343_v0  ;;  %232 = vmatprep.subr.mxu1 %v343_v0 }
  0x41   :  { %146 = vmatpush2.msra.mxu0 %v73_v18  ;;  %256 = vmatpush2.msra.mxu1 %v73_v18 }
  0x42   :  { %147 = vmatprep.subr.mxu0 %v343_v0  ;;  %233 = vmatprep.subr.mxu1 %v343_v0 }
  0x43   :  { %148 = vmatpush2.msra.mxu0 %v72_v19  ;;  %257 = vmatpush2.msra.mxu1 %v72_v19 }
  0x44   :  { %149 = vmatprep.subr.mxu0 %v343_v0  ;;  %234 = vmatprep.subr.mxu1 %v343_v0 }
  0x45   :  { %150 = vmatpush2.msra.mxu0 %v71_v20  ;;  %258 = vmatpush2.msra.mxu1 %v71_v20 }
  0x46   :  { %151 = vmatprep.subr.mxu0 %v343_v0  ;;  %235 = vmatprep.subr.mxu1 %v343_v0 }
  0x47   :  { %152 = vmatpush2.msra.mxu0 %v70_v21  ;;  %259 = vmatpush2.msra.mxu1 %v70_v21 }
  0x48   :  { %153 = vmatprep.subr.mxu0 %v343_v0  ;;  %236 = vmatprep.subr.mxu1 %v343_v0 }
  0x49   :  { %154 = vmatpush2.msra.mxu0 %v69_v22  ;;  %260 = vmatpush2.msra.mxu1 %v69_v22 }
  0x4a   :  { %155 = vmatprep.subr.mxu0 %v343_v0  ;;  %237 = vmatprep.subr.mxu1 %v343_v0 }
  0x4b   :  { %156 = vmatpush2.msra.mxu0 %v68_v23  ;;  %261 = vmatpush2.msra.mxu1 %v68_v23 }
  0x4c   :  { %157 = vmatprep.subr.mxu0 %v343_v0  ;;  %238 = vmatprep.subr.mxu1 %v343_v0 }
  0x4d   :  { %158 = vmatpush2.msra.mxu0 %v67_v24  ;;  %262 = vmatpush2.msra.mxu1 %v67_v24 }
  0x4e   :  { %211 = vmatprep.mubr.msk.f32.mxu0 %vm82_vm0, %v44_v25  ;;  %213 = vmatprep.mubr.msk.f32.mxu1 %vm82_vm0, %v48_v26 }
  0x4f   :  { %160 = vmatmul.mubr.f32.vlgmr.msra.gmra.mxu0 %v43_v27  ;;  %170 = vmatmul.mubr.f32.vlgmr.msra.gmra.mxu1 %v47_v28 }
  0x50   :  { %212 = vmatprep.mubr.msk.f32.mxu0 %vm82_vm0, %v46_v29  ;;  %214 = vmatprep.mubr.msk.f32.mxu1 %vm82_vm0, %v50_v30 }
  0x53   :  { %165 = vmatmul.mubr.f32.gmra.mxu0 %v45_v31  ;;  %175 = vmatmul.mubr.f32.gmra.mxu1 %v49_v32 }
 0x10f   :  { %v161_v34 = vpop.f32.mrf.mxu0  ;;  %v171_v35 = vpop.f32.mrf.mxu1 }
 0x110   :  { %v162_v36 = vadd.f32 %v210_v33, %v161_v34  ;;  %v172_v37 = vadd.f32 %v210_v33, %v171_v35 }
 0x111   :  { %v163_v38 = vpop.f32.mrf.mxu0  ;;  %v173_v39 = vpop.f32.mrf.mxu1 }
 0x112   :  { %v180_v40 = vmul.f32 0.2, %v162_v36  ;;  %v182_v41 = vmul.f32 0.2, %v172_v37 }
 0x113   :  { %v166_v42 = vpop.f32.mrf.mxu0  ;;  %v176_v43 = vpop.f32.mrf.mxu1 }
 0x114   :  { %v184_v44 = vmax.f32 %v162_v36, %v180_v40  ;;  %v186_v45 = vmax.f32 %v172_v37, %v182_v41  ;;  %v167_v46 = vadd.f32 %v210_v33, %v166_v42  ;;  %v177_v47 = vadd.f32 %v210_v33, %v176_v43 }
 0x115   :  { %v168_v48 = vpop.f32.mrf.mxu0  ;;  %v178_v49 = vpop.f32.mrf.mxu1 }
 0x116   :  { %188 = vst [vmem:[#allocation7] sm:$0xff] %v184_v44  ;;  %190 = vst [vmem:[#allocation7 + $0x10] sm:$0xff] %v186_v45  ;;  %v181_v50 = vmul.f32 0.2, %v167_v46  ;;  %v183_v51 = vmul.f32 0.2, %v177_v47 }
 0x118   :  { %v185_v52 = vmax.f32 %v167_v46, %v181_v50  ;;  %v187_v53 = vmax.f32 %v177_v47, %v183_v51 }
 0x11a   :  { %189 = vst [vmem:[#allocation7 + $0x8] sm:$0xff] %v185_v52  ;;  %191 = vst [vmem:[#allocation7 + $0x18] sm:$0xff] %v187_v53 }
 0x11b   :  { %322 = shalt.err (!%p319_p0)
}
 0x11c   :  { %203 = dma.vmem_to_hbm [thread:$0]  %s198_s27, 512, %s434_s3, [#allocation4], %s341_s22, %s341_s22, %s342_s23  }
 0x11d   :  { %335 = dma.done.wait [#allocation4], 512  }
 0x11e   :  { %336 = vsyncadd [#allocation4], 4294966784 }
 0x11f   :  { %207 = vsyncpa [#allocation3], 1 }
 0x120   :  { %208 = vsyncpa [#allocation6], 1 }
 0x121   :  { %209 = vsyncpa [#allocation4], 1 }

</bundles_post_ra>
